<compile_context>
chip_gen: v6e
topology: v6e:2x2x1
jax: 0.10.0
libtpu: 0.0.40
codegen_flags: <defaults>
</compile_context>

<pallas_src>
import jax
import jax.numpy as jnp
from jax.experimental import pallas as pl
from jax.experimental.pallas import tpu as pltpu

LANE = 128
VMEM_TILE_BUDGET_BYTES = 12 * 1024 * 1024   # double-buffered x+out tiles, v5e-safe
VMEM_LIMIT_BYTES = 32 * 1024 * 1024          # explicit scoped-VMEM limit
MAX_TILE_HW = 128 * 1024                     # hard cap on lanes per tile
MIN_GRID_STEPS = 8                           # keep both v7x TCs fed + pipeline depth


def outconv_kernel(x_ref, w_ref, b_ref, o_ref):
    # x_ref: (1, C_in, tile_hw)   one batch element, one spatial tile
    # w_ref: (C_out, C_in)        1x1 conv weight (fetched once, constant index)
    # b_ref: (C_out, 1)           bias (f32)
    # o_ref: (1, C_out, tile_hw)
    x = x_ref[0]                                                # (C_in, tile_hw)
    acc = jnp.dot(w_ref[...], x,
                  preferred_element_type=jnp.float32)           # (C_out, tile_hw) f32
    o_ref[0] = (acc + b_ref[...]).astype(o_ref.dtype)           # bias bcast over lanes


def _choose_tile_blocks(n_blocks, batch, max_blocks):
    """Largest 128-lane-block count per tile that fits the VMEM budget while
    keeping at least min(MIN_GRID_STEPS, batch*n_blocks) grid steps."""
    target_steps = min(MIN_GRID_STEPS, batch * n_blocks)
    divisors = [d for d in range(1, n_blocks + 1) if n_blocks % d == 0]
    divisors.sort(reverse=True)
    for d in divisors:
        if d <= max_blocks and batch * (n_blocks // d) >= target_steps:
            return d
    for d in divisors:                     # fallback: biggest tile within VMEM budget
        if d <= max_blocks:
            return d
    return 1


def outconv_forward(x, weight, bias):
    """x: (B, C_in, H, W); weight: (C_out, C_in, 1, 1); bias: (C_out,)."""
    B, C_in, H, W = x.shape
    C_out = weight.shape[0]
    HW = H * W

    # Keep the activation dtype on the matmul path (native bf16 MXU when x is bf16);
    # bias is added on the f32 accumulator, so keep it f32.
    w2d = weight.reshape(C_out, C_in).astype(x.dtype)
    b2d = bias.reshape(C_out, 1).astype(jnp.float32)

    itemsize = jnp.dtype(x.dtype).itemsize

    # Minimal 128-lane rounding of the spatial extent.
    hw_round = ((HW + LANE - 1) // LANE) * LANE
    n_blocks = hw_round // LANE

    # VMEM budget per grid step: double-buffered x tile + double-buffered out tile.
    bytes_per_lane_block = 2 * (C_in + C_out) * LANE * itemsize
    max_blocks = max(1, min(VMEM_TILE_BUDGET_BYTES // bytes_per_lane_block,
                            MAX_TILE_HW // LANE))

    tile_blocks = _choose_tile_blocks(n_blocks, B, max_blocks)
    tile_hw = tile_blocks * LANE
    n_hw = n_blocks // tile_blocks

    # Reshape (free: merges contiguous trailing dims). Pad only when HW is not a
    # multiple of 128 — and then only by the minimal amount.
    x_flat = x.reshape(B, C_in, HW)
    if hw_round != HW:
        x_flat = jnp.pad(x_flat, ((0, 0), (0, 0), (0, hw_round - HW)))

    cost = pl.CostEstimate(
        flops=2 * B * C_out * C_in * HW,
        transcendentals=0,
        bytes_accessed=(B * C_in * HW + C_out * C_in + C_out
                        + B * C_out * HW) * itemsize,
    )

    out_flat = pl.pallas_call(
        outconv_kernel,
        out_shape=jax.ShapeDtypeStruct((B, C_out, hw_round), x.dtype),
        grid_spec=pltpu.PrefetchScalarGridSpec(
            num_scalar_prefetch=0,
            grid=(B, n_hw),
            in_specs=[
                pl.BlockSpec((1, C_in, tile_hw), lambda b, j: (b, 0, j)),
                pl.BlockSpec((C_out, C_in), lambda b, j: (0, 0)),
                pl.BlockSpec((C_out, 1), lambda b, j: (0, 0)),
            ],
            out_specs=pl.BlockSpec((1, C_out, tile_hw), lambda b, j: (b, 0, j)),
        ),
        compiler_params=pltpu.CompilerParams(
            dimension_semantics=("parallel", "parallel"),
            vmem_limit_bytes=VMEM_LIMIT_BYTES,
        ),
        cost_estimate=cost,
    )(x_flat, w2d, b2d)

    if hw_round != HW:
        out_flat = out_flat[:, :, :HW]
    return out_flat.reshape(B, C_out, H, W)


def outconv_reference(x, weight, bias):
    """Pure-JAX reference mirroring the PyTorch Conv2d(kernel_size=1) forward."""
    C_out, C_in = weight.shape[0], weight.shape[1]
    w2d = weight.reshape(C_out, C_in)
    y = jnp.einsum('oc,bchw->bohw', w2d, x)
    return y + bias[None, :, None, None]


if __name__ == "__main__":
    key = jax.random.PRNGKey(0)
    kx, kw, kb = jax.random.split(key, 3)

    B, C_in, C_out, H, W = 2, 4, 3, 16, 16

    x = jax.random.normal(kx, (B, C_in, H, W), dtype=jnp.float32)
    # Conv2d(C_in, C_out, kernel_size=1) params: weight (C_out, C_in, 1, 1), bias (C_out,)
    fan_in = float(C_in)
    weight = jax.random.normal(kw, (C_out, C_in, 1, 1), dtype=jnp.float32) / jnp.sqrt(fan_in)
    bias = jax.random.normal(kb, (C_out,), dtype=jnp.float32) * 0.1

    out = outconv_forward(x, weight, bias)
    out = jax.block_until_ready(out)

    ref = outconv_reference(x, weight, bias)
    assert out.shape == ref.shape, "shape mismatch vs reference"
    assert jnp.allclose(out, ref, atol=1e-5, rtol=1e-5), "mismatch vs reference"

    print("KERNEL_OK")
</pallas_src>

<mosaic_0001>
module attributes {stable_mosaic.version = 11 : i64} {
  func.func @outconv_kernel(%arg0: i32, %arg1: i32, %arg2: memref<1x4x128xf32, #tpu.memory_space<vmem>>, %arg3: memref<3x4xf32, #tpu.memory_space<vmem>>, %arg4: memref<3x1xf32, #tpu.memory_space<vmem>>, %arg5: memref<1x3x128xf32, #tpu.memory_space<vmem>>) attributes {dimension_semantics = [#tpu.dimension_semantics<parallel>, #tpu.dimension_semantics<parallel>], iteration_bounds = array<i64: 2, 2>, scalar_prefetch = 0 : i64, scratch_operands = 0 : i64, tpu.core_type = #tpu.core_type<tc>, window_params = [{transform_indices = @transform_0, window_bounds = array<i64: 1, 4, 128>}, {pipeline_mode = #tpu.pipeline_mode<synchronous>, transform_indices = @transform_1, window_bounds = array<i64: 3, 4>}, {pipeline_mode = #tpu.pipeline_mode<synchronous>, transform_indices = @transform_2, window_bounds = array<i64: 3, 1>}, {transform_indices = @transform_3, window_bounds = array<i64: 1, 3, 128>}]} {
    %c0 = arith.constant 0 : index
    %c0_0 = arith.constant 0 : index
    %c0_1 = arith.constant 0 : index
    %0 = vector.load %arg2[%c0, %c0_0, %c0_1] : memref<1x4x128xf32, #tpu.memory_space<vmem>>, vector<1x4x128xf32>
    %1 = vector.shape_cast %0 : vector<1x4x128xf32> to vector<4x128xf32>
    %c0_2 = arith.constant 0 : index
    %c0_3 = arith.constant 0 : index
    %2 = vector.load %arg3[%c0_2, %c0_3] : memref<3x4xf32, #tpu.memory_space<vmem>>, vector<3x4xf32>
    %cst = arith.constant dense<0.000000e+00> : vector<3x128xf32>
    %3 = tpu.matmul %2, %1, %cst {dimension_numbers = #tpu.dot_dimension_numbers<[1], [0], [0], [1], [0, 0, 1, 1], [], []>} : vector<3x4xf32>, vector<4x128xf32>, vector<3x128xf32> -> vector<3x128xf32>
    %c0_4 = arith.constant 0 : index
    %c0_5 = arith.constant 0 : index
    %4 = vector.load %arg4[%c0_4, %c0_5] : memref<3x1xf32, #tpu.memory_space<vmem>>, vector<3x1xf32>
    %5 = vector.broadcast %4 : vector<3x1xf32> to vector<3x128xf32>
    %6 = arith.addf %3, %5 : vector<3x128xf32>
    %c0_6 = arith.constant 0 : index
    %c0_7 = arith.constant 0 : index
    %c0_8 = arith.constant 0 : index
    %7 = vector.load %arg5[%c0_6, %c0_7, %c0_8] : memref<1x3x128xf32, #tpu.memory_space<vmem>>, vector<1x3x128xf32>
    %8 = vector.shape_cast %7 : vector<1x3x128xf32> to vector<3x128xf32>
    %9 = vector.shape_cast %6 : vector<3x128xf32> to vector<1x3x128xf32>
    tpu.vector_store %arg5[%c0_6, %c0_7, %c0_8], %9 {strides = array<i32>} : memref<1x3x128xf32, #tpu.memory_space<vmem>>, vector<1x3x128xf32>,
    return
  }
  func.func @transform_0(%arg0: i32, %arg1: i32) -> (i32, i32, i32) {
    %c0_i32 = arith.constant 0 : i32
    %c0_i32_0 = arith.constant 0 : i32
    return %arg0, %c0_i32, %arg1 : i32, i32, i32
  }
  func.func @transform_1(%arg0: i32, %arg1: i32) -> (i32, i32) {
    %c0_i32 = arith.constant 0 : i32
    %c0_i32_0 = arith.constant 0 : i32
    %c0_i32_1 = arith.constant 0 : i32
    return %c0_i32, %c0_i32_0 : i32, i32
  }
  func.func @transform_2(%arg0: i32, %arg1: i32) -> (i32, i32) {
    %c0_i32 = arith.constant 0 : i32
    %c0_i32_0 = arith.constant 0 : i32
    %c0_i32_1 = arith.constant 0 : i32
    return %c0_i32, %c0_i32_0 : i32, i32
  }
  func.func @transform_3(%arg0: i32, %arg1: i32) -> (i32, i32, i32) {
    %c0_i32 = arith.constant 0 : i32
    %c0_i32_0 = arith.constant 0 : i32
    return %arg0, %c0_i32, %arg1 : i32, i32, i32
  }
}

</mosaic_0001>

<bundles_post_ra>
// kernel: tpu_custom_call.1
= control target key start
LH: loop header
LB: loop body
LE: loop exit
PB: predicated region body
PF: predicated region fallthrough
CT: control target
= control target key end

     0   :  { %8 = vsyncpa [#allocation3], 0  ;;  %s743_s0 = inlined_call_operand.hbm [shape: f32[2,4,256], index: 0, kind: input, shape index: {}]   ;;  %s744_s1 = inlined_call_operand.vmem [shape: f32[3,4], index: 1, kind: input, shape index: {}]   ;;  %s745_s2 = inlined_call_operand.vmem [shape: f32[3,1], index: 2, kind: input, shape index: {}]   ;;  %s746_s3 = inlined_call_operand.vmem [shape: f32[2,3,256], index: 3, kind: output, shape index: {}]  }
   0x1   :  { %10 = vsyncpa [#allocation3 + $0x1], 0  ;;  %s610_s12 = smov 0   ;;  %s612_s13 = smov 0  }
   0x2   :  { %s614_s14 = smov 0   ;;  %s616_s15 = smov 0  }
   0x3   :  { %s618_s16 = smov 0   ;;  %s620_s17 = smov 0  }
   0x4   :  { %s622_s18 = smov 0   ;;  %s624_s19 = smov 0  }
   0x5 LB: > { %s393_s20 = sadd.s32 4294967295, %s584_s19   ;;  %s25_s21 = sadd.s32 1, %s576_s17  ;;  %s584_s19 = sphi %s624_s19, %s16_s19   ;;  %s580_s18 = sphi %s622_s18, %s756_s18   ;;  %s576_s17 = sphi %s620_s17, %s755_s17   ;;  %s572_s16 = sphi %s618_s16, %s754_s16   ;;  %s568_s15 = sphi %s616_s15, %s753_s15   ;;  %s564_s14 = sphi %s614_s14, %s752_s14   ;;  %s560_s13 = sphi %s612_s13, %s751_s13   ;;  %s556_s12 = sphi %s610_s12, %s750_s12  }
   0x6   : > { %p26_p0 = scmp.ge.s32.totalorder %s25_s21, 2  ;;  %s28_s22 = sadd.s32 1, %s580_s18 }
   0x7   : > { %s37_s23 = sadd.s32 1, %s564_s14  ;;  %p44_p1 = scmp.ne.s32.totalorder %s564_s14, %s560_s13 }
   0x8   : > { %s758_s21 = smov (%p26_p0, %s25_s21), 0  ;;  %s760_s22 = smov (!%p26_p0, %s28_s22), %s580_s18 }
   0x9   : > { %s33_s24 = ssub.s32 %s576_s17, %s758_s21  ;;  %p45_p2 = scmp.eq.s32.totalorder %s584_s19, 0 }
   0xa   : > { %p30_p3 = scmp.ge.s32.totalorder %s760_s22, 2  ;;  %p50_p4 = scmp.ne.s32.totalorder %s560_s13, %s556_s12 }
   0xb   : > { %p661_p5 = por %p45_p2, %p44_p1  ;;  %p51_p6 = scmp.eq.s32.totalorder %s393_s20, 0 }
   0xc   : > { %s762_s22 = smov (%p30_p3, %s760_s22), 0  ;;  %p421_p8 = scmp.lt.s32.totalorder %s584_s19, 4 }
   0xd   : > { %p667_p7 = por %p51_p6, %p50_p4  ;;  %s32_s27 = ssub.s32 %s580_s18, %s762_s22 }
   0xe   : > { %s34_s28 = sor.u32 %s33_s24, %s32_s27  ;;  %s150_s29 = sand.u32 1, %s564_s14  }
   0xf   : > { %p35_p9 = scmp.eq.s32.totalorder %s34_s28, 0  ;;  %s397_s30 = sshll.u32 %s150_s29, 2 }
  0x10   : > { %s398_s4 = sshll.u32 %s580_s18, 1  ;;  %s154_s8 = scalar_lea.vmem [#allocation2], %s397_s30 }
  0x11   : > { %s677_s5 = scalar_select %p35_p9, %s564_s14, %s37_s23  }
  0x12   : > { %s159_s6 = sadd.s32 %s576_s17, %s398_s4  ;;  %s163_s9 = sshll.u32 %s154_s8, 4  ;;  %s164_s9 = int_to_ptr.vmem [resolvable:$true] %s163_s9 }
  0x13   : > { %s399_s7 = sshll.u32 %s159_s6, 6  ;;  %p687_p10 = pnand %p421_p8, %p661_p5 }
  0x14   : > { %s161_s12 = scalar_lea.hbm %s743_s0, %s399_s7  ;;  %p400_p11 = scmp.ge.s32.totalorder %s584_s19, 1 }
  0x15   : > { %p168_p12 = scmp.lt.s32.totalorder %s584_s19, 5  ;;  %s151_s23 = scalar_lea.sflag [#allocation3], %s150_s29 }
  0x16   : > { %p492_p13 = pneg %p687_p10  ;;  %s503_s24 = scalar_lea.vmem %s164_s9, 64 }
  0x17   : > { %p504_p0 = scmp.ne.s32.totalorder %s164_s9, %s503_s24  ;;  %s586_s27 = smov [#allocation2]  }
  0x18   : > { %s508_s28 = sshll.u32 %s586_s27, 4  ;;  %s509_s28 = int_to_ptr.vmem [resolvable:$false] %s508_s28 }
  0x19   : > { %p506_p1 = pnand %p504_p0, %p492_p13  ;;  %s510_s30 = scalar_lea.vmem %s509_s28, 128 }
  0x1a   : > { %p511_p3 = scmp.lt.s32.totalorder %s164_s9, %s509_s28  ;;  %p512_p4 = scmp.lt.s32.totalorder %s510_s30, %s503_s24 }
  0x1b   : > { %p507_p2 = pneg %p506_p1 }
  0x1c   : > { %p513_p5 = por %p512_p4, %p511_p3 }
  0x1e   : > { %p514_p6 = pnand %p513_p5, %p507_p2 }
  0x20   : > { %517 = shalt.err (!%p514_p6)
}
  0x21   : > { %420 = dma.hbm_to_vmem [thread:$0]  (!%p687_p10), %s161_s12, 64, %s164_s9, %s151_s23  }
  0x22   : > { %p169_p8 = pnand %p400_p11, %p168_p12 }
  0x23   : > { %s174_s25 = sand.u32 (!%p169_p8), 1, %s560_s13  }
  0x24   : > { %172 = sbr.rel (%p169_p8) target bundleno = 241 (0xf1), region = 32  ;;  %s401_s29 = sshll.u32 (!%p169_p8), %s174_s25, 2 }
  0x25   : > { %s175_s4 = scalar_lea.sflag (!%p169_p8), [#allocation3], %s174_s25  ;;  %s178_s6 = scalar_lea.vmem (!%p169_p8), [#allocation2], %s401_s29 }
  0x29   : > { %551 = dma.done.wait (%p667_p7), %s175_s4, 64  }
  0x2a   : > { %553 = vsyncadd (%p667_p7), %s175_s4, 4294967232  ;;  %v587_v0 = vmov 0.0   ;;  %vm588_vm0 = vmmov 0   ;;  %v589_v1 = vmov 0   ;;  %vm224_vm1 = vcmask 1043456   ;;  %p204_p7 = scmp.lt.s32.totalorder %s572_s16, 1 }
  0x2b   : > { %410 = vmatprep.subr.mxu0 %v587_v0  ;;  %412 = vmatprep.mubr.msk.f32.mxu0 %vm588_vm0, %v587_v0  ;;  %vm220_vm2 = vcmask 31744   ;;  %v212_v2 = vld [vmem:[%s178_s6] sm:$0xf]  ;;  %p206_p9 = scmp.lt.s32.totalorder %s568_s15, 1 }
  0x2c   : > { %489 = vset.pattern.permute.xlu0 %v589_v1  ;;  %v213_v3 = vld [vmem:[%s744_s1] sm:$0x7]  ;;  %411 = vmatpush3.msk.msra.mxu0 %vm224_vm1, %v212_v2  ;;  %s764_s16 = smov (!%p204_p7, %s572_s16), 1 }
  0x2d   : > { %v214_v4 = vld [vmem:[%s745_s2] sm:$0x7]  ;;  %413 = vmatmul.mubr.msk.f32.vlgmr.msra.gmra.mxu0 %vm220_vm2, %v213_v3  ;;  %s766_s15 = smov (!%p206_p9, %s568_s15), 1  ;;  %s402_s10 = sshll.u32 %s764_s16, 1 }
  0x2e   : > { %217 = vperm.xlu0 %489, %v214_v4   ;;  %s209_s11 = sadd.s32 %s402_s10, %s766_s15 }
  0x2f   : > { %s403_s12 = sshll.u32 %s209_s11, 2 }
  0x30   : > { %s211_s24 = scalar_lea.vmem %s746_s3, %s403_s12 }
  0xa9   : > { %v218_v5 = vpop.permute.xlu0 %217 }
  0xed   : > { %v294_v6 = vpop.f32.mrf.mxu0 }
  0xee   : > { %v295_v7 = vadd.f32 %v294_v6, %v218_v5 }
  0xef   : > { %v414_v8 = vpop.f32.mrf.mxu0 }
  0xf0   : > { %298 = vst [vmem:[%s211_s24] sm:$0x7] %v295_v7 }
  0xf1 PF: > { %s16_s19 = sadd.s32 1, %s584_s19   ;;  %s750_s12 = smov %s560_s13 }
  0xf2   : > { %p13_p10 = scmp.ge.s32.totalorder %s16_s19, 6   ;;  %s751_s13 = smov %s564_s14 }
  0xf3   : > { %s752_s14 = smov %s677_s5  ;;  %s753_s15 = smov %s576_s17 }
  0xf4   : > { %s754_s16 = smov %s580_s18  ;;  %s755_s17 = smov %s758_s21 }
  0xf5   : > { %s756_s18 = smov %s762_s22  ;;  %15 = sbr.rel (!%p13_p10) target bundleno = 5 (0x5), region = 72 }
  0xfa   :  { %326 = vsyncpa [#allocation3], 1 }
  0xfb   :  { %328 = vsyncpa [#allocation3 + $0x1], 1 }

</bundles_post_ra>
